<compile_context>
chip_gen: v7x
topology: tpu7x:2x2x1
jax: 0.10.0
libtpu: 0.0.40
codegen_flags: <defaults>
</compile_context>

<pallas_src>
import math
import functools

import jax
import jax.numpy as jnp
from jax.experimental import pallas as pl
from jax.experimental.pallas import tpu as pltpu


# ---------------------------------------------------------------------------
# Kernels
# ---------------------------------------------------------------------------
def _pe_add_kernel(x_ref, pe_ref, o_ref):
    """out = x + pe ; pe (1, T) broadcasts over the (TB, T) batch tile."""
    o_ref[...] = (x_ref[...] + pe_ref[...]).astype(o_ref.dtype)


def _pe_add_scale_kernel(x_ref, pe_ref, scale_ref, o_ref):
    """Portable dropout path: out = (x + pe) * scale, with scale precomputed
    host-side as keep_mask / keep_prob (runs on any backend / interpret)."""
    o_ref[...] = ((x_ref[...] + pe_ref[...]) * scale_ref[...]).astype(o_ref.dtype)


def _pe_add_dropout_prng_kernel(dropout_p, seed_ref, x_ref, pe_ref, o_ref):
    """TPU path: inverted dropout with the in-kernel hardware PRNG
    (no extra HBM traffic for the mask)."""
    y = x_ref[...] + pe_ref[...]
    keep = 1.0 - dropout_p
    # Independent stream per block: prng_seed hashes all seed words together.
    pltpu.prng_seed(seed_ref[0], pl.program_id(0), pl.program_id(1))
    bits = pltpu.bitcast(pltpu.prng_random_bits(y.shape), jnp.uint32)
    # keep-probability threshold on raw uint32 bits (bias < 2**-32, negligible).
    thresh = jnp.uint32(min(int(keep * 2.0 ** 32), 2 ** 32 - 1))
    inv_keep = jnp.asarray(1.0 / keep, y.dtype)
    # TODO(synk): if xprof shows the PRNG issue rate (not HBM) binding on v7x,
    # draw one uint32 per 4 elements and compare uint8 sub-bytes instead.
    o_ref[...] = jnp.where(bits < thresh, y * inv_keep,
                           jnp.zeros((), y.dtype)).astype(o_ref.dtype)


# ---------------------------------------------------------------------------
# Host-side tiling heuristics
# ---------------------------------------------------------------------------
def _sublane_multiple(itemsize):
    # full vreg packing: (8,128) f32, (16,128) bf16, (32,128) int8/fp8
    return {4: 8, 2: 16, 1: 32}.get(itemsize, 8)


def _round_up(v, m):
    return (v + m - 1) // m * m


def _choose_tiles(batch, sd, itemsize, *,
                  target_block_bytes=2 * 1024 * 1024,
                  max_block_bytes=4 * 1024 * 1024):
    """Pick (batch_tile, feature_tile) for the (B, S*D) layout.

    Blocks target the 2-4 MiB band (~86% of measured HBM roofline for f32
    streaming; big enough to amortize the ~0.35us/step overhead even at v7x's
    3.2 TB/s). Grids use pl.cdiv, so tiles need not divide the array.
    """
    sub = _sublane_multiple(itemsize)

    # Feature (lane) tile: keep the full row whenever a minimal batch tile of
    # it still fits a max-size block; otherwise the largest multiple of 128
    # that does (partial edge block handled by the cdiv grid).
    if sd <= 128 or sd * itemsize * sub <= max_block_bytes:
        t = sd
    else:
        t = max(128, (max_block_bytes // (itemsize * sub)) // 128 * 128)

    # Batch (sublane) tile: as many rows as fit max_block_bytes, rounded to the
    # dtype's packing multiple. A full-batch block is always layout-legal.
    row_bytes = t * itemsize
    tb = max(sub, (max_block_bytes // row_bytes) // sub * sub)
    if tb >= batch:
        tb = batch

    # v7x megacore: if everything landed in one block but there is a
    # meaningful amount of work, split so both TensorCores get a grid step.
    if tb == batch and t == sd and batch * sd * itemsize >= 2 * target_block_bytes:
        if batch >= 2 * sub:
            tb = _round_up((batch + 1) // 2, sub)
        elif sd >= 256:
            t = max(128, _round_up((sd + 1) // 2, 128))

    return tb, t


# ---------------------------------------------------------------------------
# PE table (identical to the torch __init__ buffer)
# ---------------------------------------------------------------------------
def make_positional_encoding_table(max_len, d_model):
    position = jnp.arange(max_len, dtype=jnp.float32)[:, None]              # (L, 1)
    div_term = jnp.exp(
        jnp.arange(0, d_model, 2, dtype=jnp.float32)
        * -(math.log(10000.0) / d_model)
    )                                                                        # (D/2,)
    angles = position * div_term                                             # (L, D/2)
    pe = jnp.zeros((max_len, d_model), dtype=jnp.float32)
    pe = pe.at[:, 0::2].set(jnp.sin(angles))
    pe = pe.at[:, 1::2].set(jnp.cos(angles))
    return pe


def prepare_pe_row(pe_table, seq_len, dtype):
    """Slice/cast/flatten the PE buffer to (1, seq_len*d_model).
    Do this once per (seq_len, dtype) and reuse it across forwards."""
    d_model = pe_table.shape[-1]
    return pe_table[:seq_len].astype(dtype).reshape(1, seq_len * d_model)


# ---------------------------------------------------------------------------
# Forward wrapper
# ---------------------------------------------------------------------------
def positional_encoding_forward(x, pe_row, *, dropout_p=0.1,
                                training=False, seed=0):
    """x: (B, S, D); pe_row: (1, S*D) from prepare_pe_row. Returns (B, S, D)."""
    B, S, D = x.shape
    SD = S * D
    assert pe_row.shape == (1, SD), (pe_row.shape, (1, SD))
    pe_row = pe_row.astype(x.dtype)

    # Lane-dense flattening: last dim becomes S*D (multiple of 128 for typical
    # ViT widths) -> unmasked, full-lane vector stores.
    x2 = x.reshape(B, SD)

    itemsize = jnp.dtype(x.dtype).itemsize
    TB, T = _choose_tiles(B, SD, itemsize)
    nf, nb = pl.cdiv(SD, T), pl.cdiv(B, TB)

    # grid = (feature, batch): batch is the innermost (fastest) axis, so the pe
    # block index (0, f) stays constant across consecutive steps and Pallas
    # skips the pe re-DMA.
    grid = (nf, nb)
    x_spec = pl.BlockSpec((TB, T), lambda f, b: (b, f))
    pe_spec = pl.BlockSpec((1, T), lambda f, b: (0, f))
    out_spec = pl.BlockSpec((TB, T), lambda f, b: (b, f))
    out_shape = jax.ShapeDtypeStruct((B, SD), x.dtype)

    apply_dropout = training and dropout_p > 0.0
    keep = 1.0 - float(dropout_p)
    if apply_dropout and keep <= 0.0:
        return jnp.zeros_like(x)          # p == 1: torch drops everything

    # In-kernel hardware PRNG only lowers on real TPUs; elsewhere (CPU /
    # interpret mode) stream a precomputed scale mask instead.
    use_inkernel_prng = apply_dropout and jax.default_backend() == "tpu"
    n_streamed_blocks = 2 + (1 if (apply_dropout and not use_inkernel_prng) else 0)

    # Raise the scoped-VMEM limit for the double-buffered working set (v5e's
    # 16 MiB default is too small for 4 MiB blocks); cap at 48 MiB, safe on
    # every generation including v7x's 64 MiB physical VMEM.
    block_bytes = TB * T * itemsize
    needed = 2 * (n_streamed_blocks * block_bytes + T * itemsize)
    vmem_limit = int(min(48 * 1024 * 1024, max(16 * 1024 * 1024, 2 * needed)))
    compiler_params = pltpu.CompilerParams(
        dimension_semantics=("parallel", "parallel"),
        vmem_limit_bytes=vmem_limit)

    if not apply_dropout:
        out2 = pl.pallas_call(
            _pe_add_kernel,
            out_shape=out_shape,
            grid=grid,
            in_specs=[x_spec, pe_spec],
            out_specs=out_spec,
            compiler_params=compiler_params,
        )(x2, pe_row)
    elif use_inkernel_prng:
        seed_arr = jnp.array([seed], dtype=jnp.int32)
        seed_spec = pl.BlockSpec(memory_space=pltpu.MemorySpace.SMEM)
        out2 = pl.pallas_call(
            functools.partial(_pe_add_dropout_prng_kernel, float(dropout_p)),
            out_shape=out_shape,
            grid=grid,
            in_specs=[seed_spec, x_spec, pe_spec],
            out_specs=out_spec,
            compiler_params=compiler_params,
        )(seed_arr, x2, pe_row)
    else:
        # Portable fallback (non-TPU backends / interpret): precomputed
        # inverted-dropout scale (keep_mask / keep) streamed alongside x.
        # Semantics are identical to torch dropout; RNG stream differs.
        keep_mask = jax.random.bernoulli(jax.random.PRNGKey(seed), keep, (B, SD))
        scale = keep_mask.astype(x.dtype) / jnp.asarray(keep, x.dtype)
        out2 = pl.pallas_call(
            _pe_add_scale_kernel,
            out_shape=out_shape,
            grid=grid,
            in_specs=[x_spec, pe_spec, x_spec],
            out_specs=out_spec,
            compiler_params=compiler_params,
        )(x2, pe_row, scale)

    return out2.reshape(B, S, D)


# ---------------------------------------------------------------------------
if __name__ == "__main__":
    B, S, D = 2, 8, 32
    MAX_LEN = 64          # small max_len consistent with the module (default 5000)
    DROPOUT_P = 0.1

    key = jax.random.PRNGKey(0)
    x = jax.random.normal(key, (B, S, D), dtype=jnp.float32)
    pe_table = make_positional_encoding_table(MAX_LEN, D)
    pe_row = prepare_pe_row(pe_table, S, x.dtype)     # cache once per (S, dtype)

    ref = x + pe_table[:S][None, :, :]

    # Eval-mode forward (dropout == identity): deterministic, checkable.
    out = positional_encoding_forward(
        x, pe_row, dropout_p=DROPOUT_P, training=False)
    out = jax.block_until_ready(out)
    assert out.shape == (B, S, D)
    assert jnp.allclose(out, ref, atol=1e-6, rtol=1e-6), "eval mismatch vs reference"

    # Train-mode forward: stochastic inverted dropout. Check that kept elements
    # equal (x + pe) / keep and dropped elements are exactly zero.
    out_tr = positional_encoding_forward(
        x, pe_row, dropout_p=DROPOUT_P, training=True, seed=1234)
    out_tr = jax.block_until_ready(out_tr)
    assert out_tr.shape == (B, S, D)
    keep_p = 1.0 - DROPOUT_P
    kept_mask = out_tr != 0
    assert jnp.allclose(jnp.where(kept_mask, out_tr * keep_p, 0.0),
                        jnp.where(kept_mask, ref, 0.0),
                        atol=1e-5, rtol=1e-5), "train-mode scaling mismatch"

    print("KERNEL_OK")
</pallas_src>

<mosaic_0001>
module attributes {stable_mosaic.version = 11 : i64} {
  func.func @_pe_add_kernel(%arg0: i32, %arg1: i32, %arg2: memref<2x256xf32, #tpu.memory_space<vmem>>, %arg3: memref<1x256xf32, #tpu.memory_space<vmem>>, %arg4: memref<2x256xf32, #tpu.memory_space<vmem>>) attributes {dimension_semantics = [#tpu.dimension_semantics<parallel>, #tpu.dimension_semantics<parallel>], iteration_bounds = array<i64: 1, 1>, scalar_prefetch = 0 : i64, scratch_operands = 0 : i64, tpu.core_type = #tpu.core_type<tc>, window_params = [{transform_indices = @transform_0, window_bounds = array<i64: 2, 256>}, {transform_indices = @transform_1, window_bounds = array<i64: 1, 256>}, {transform_indices = @transform_2, window_bounds = array<i64: 2, 256>}]} {
    %c0 = arith.constant 0 : index
    %c0_0 = arith.constant 0 : index
    %0 = vector.load %arg2[%c0, %c0_0] : memref<2x256xf32, #tpu.memory_space<vmem>>, vector<2x256xf32>
    %c0_1 = arith.constant 0 : index
    %c0_2 = arith.constant 0 : index
    %1 = vector.load %arg3[%c0_1, %c0_2] : memref<1x256xf32, #tpu.memory_space<vmem>>, vector<1x256xf32>
    %2 = vector.broadcast %1 : vector<1x256xf32> to vector<2x256xf32>
    %3 = arith.addf %0, %2 : vector<2x256xf32>
    %c0_3 = arith.constant 0 : index
    %c0_4 = arith.constant 0 : index
    %4 = vector.load %arg4[%c0_3, %c0_4] : memref<2x256xf32, #tpu.memory_space<vmem>>, vector<2x256xf32>
    tpu.vector_store %arg4[%c0_3, %c0_4], %3 {strides = array<i32>} : memref<2x256xf32, #tpu.memory_space<vmem>>, vector<2x256xf32>,
    return
  }
  func.func @transform_0(%arg0: i32, %arg1: i32) -> (i32, i32) {
    %c0_i32 = arith.constant 0 : i32
    return %arg1, %arg0 : i32, i32
  }
  func.func @transform_1(%arg0: i32, %arg1: i32) -> (i32, i32) {
    %c0_i32 = arith.constant 0 : i32
    %c0_i32_0 = arith.constant 0 : i32
    return %c0_i32, %arg0 : i32, i32
  }
  func.func @transform_2(%arg0: i32, %arg1: i32) -> (i32, i32) {
    %c0_i32 = arith.constant 0 : i32
    return %arg1, %arg0 : i32, i32
  }
}

</mosaic_0001>

<bundles_post_ra>
// kernel: tpu_custom_call.1
= control target key start
LH: loop header
LB: loop body
LE: loop exit
PB: predicated region body
PF: predicated region fallthrough
CT: control target
= control target key end

     0   :  { %7 = vsyncpa [#allocation3], 0  ;;  %s157_s0 = inlined_call_operand.hbm [shape: f32[2,256], index: 0, kind: input, shape index: {}]   ;;  %s158_s1 = inlined_call_operand.vmem [shape: f32[1,256], index: 1, kind: input, shape index: {}]   ;;  %s159_s2 = inlined_call_operand.hbm [shape: f32[2,256], index: 2, kind: output, shape index: {}]  }
   0x1   :  { %8 = vsyncpa [#allocation4], 0  ;;  %s112_s9 = smov [#allocation2]   ;;  %s64_s13 = scalar_lea.hbm %s157_s0, 64 }
   0x2   :  { %s15_s10 = sshll.u32 %s112_s9, 4  ;;  %p65_p0 = scmp.ne.s32.totalorder %s157_s0, %s64_s13  ;;  %s16_s10 = int_to_ptr.vmem [resolvable:$true] %s15_s10 }
   0x3   :  { %p68_p1 = scmp.lt.u32.totalorder %s64_s13, %s157_s0 }
   0x5   :  { %p70_p2 = pnand %p68_p1, %p65_p0 }
   0x7   :  { %73 = shalt.err (!%p70_p2)
}
   0x8   :  { %s74_s18 = scalar_lea.vmem %s16_s10, 64  ;;  %p79_p4 = scmp.lt.s32.totalorder %s16_s10, %s16_s10 }
   0x9   :  { %p75_p3 = scmp.ne.s32.totalorder %s16_s10, %s74_s18  ;;  %p80_p5 = scmp.lt.s32.totalorder %s74_s18, %s74_s18 }
   0xb   :  { %p81_p6 = por %p80_p5, %p79_p4 }
   0xd   :  { %p82_p7 = pnand %p81_p6, %p75_p3 }
   0xf   :  { %85 = shalt.err (!%p82_p7)
}
  0x10   :  { %18 = dma.hbm_to_vmem [thread:$0]  %s157_s0, 64, %s16_s10, [#allocation3]  }
  0x11   :  { %108 = dma.done.wait [#allocation3], 64  }
  0x12   :  { %109 = vsyncadd [#allocation3], 4294967232  ;;  %v27_v0 = vlaneseq  ;;  %v113_v1 = vmov 1983009808   ;;  %v25_v7 = vld [vmem:[%s158_s1] sm:$0x3] }
  0x13   :  { %v37_v2 = vunpack.c.l.s4 %v113_v1  ;;  %v24_v12 = vld [vmem:[#allocation2] sm:$0xf]  ;;  %s114_s23 = smov [#allocation5]  }
  0x14   :  { %v28_v3 = vshrl.u32 %v27_v0, 7  ;;  %s52_s0 = sshll.u32 %s114_s23, 4  ;;  %s53_s0 = int_to_ptr.vmem [resolvable:$true] %s52_s0 }
  0x15   :  { %v38_v6 = vunpack.c.0.s8 %v37_v2  ;;  %s86_s24 = scalar_lea.vmem %s53_s0, 64  ;;  %p91_p9 = scmp.lt.s32.totalorder %s53_s0, %s53_s0 }
  0x16   :  { %v29_v4 = vsub.s32 0, %v28_v3  ;;  %v33_v5 = vsub.s32 1, %v28_v3  ;;  %p87_p8 = scmp.ne.s32.totalorder %s53_s0, %s86_s24  ;;  %p92_p10 = scmp.lt.s32.totalorder %s86_s24, %s86_s24 }
  0x17   :  { %v41_v10 = vsub.s32 %v38_v6, %v28_v3 }
  0x18   :  { %v30_v8 = vrot.slane %v25_v7, %v29_v4  ;;  %v34_v9 = vrot.slane %v25_v7, %v33_v5  ;;  %p93_p11 = por %p92_p10, %p91_p9 }
  0x1a   :  { %v35_v11 = vcombine.low %v30_v8, %v34_v9  ;;  %p94_p12 = pnand %p93_p11, %p87_p8 }
  0x1c   :  { %v42_v13 = vrot.slane %v35_v11, %v41_v10 }
  0x1e   :  { %v44_v14 = vadd.f32 %v42_v13, %v24_v12 }
  0x20   :  { %45 = vst [vmem:[#allocation5] sm:$0xf] %v44_v14 }
  0x21   :  { %97 = shalt.err (!%p94_p12)
}
  0x22   :  { %s98_s26 = scalar_lea.hbm %s159_s2, 64 }
  0x23   :  { %p99_p13 = scmp.ne.s32.totalorder %s159_s2, %s98_s26  ;;  %p102_p0 = scmp.lt.u32.totalorder %s98_s26, %s159_s2 }
  0x25   :  { %p104_p1 = pnand %p102_p0, %p99_p13 }
  0x27   :  { %107 = shalt.err (!%p104_p1)
}
  0x28   :  { %55 = dma.vmem_to_hbm [thread:$0]  %s53_s0, 64, %s159_s2, [#allocation4]  }
  0x29   :  { %110 = dma.done.wait [#allocation4], 64  }
  0x2a   :  { %111 = vsyncadd [#allocation4], 4294967232 }
  0x2b   :  { %59 = vsyncpa [#allocation3], 1 }
  0x2c   :  { %60 = vsyncpa [#allocation4], 1 }

</bundles_post_ra>
